<compile_context>
chip_gen: v6e
topology: v6e:2x2x1
jax: 0.10.0
libtpu: 0.0.40
codegen_flags: <defaults>
</compile_context>

<pallas_src>
import jax
import jax.numpy as jnp
from jax import lax
from jax.experimental import pallas as pl
from jax.experimental.pallas import tpu as pltpu

BLOCKSIZ = 128           # causal-mask buffer size in the torch module (only T <= BLOCKSIZ used)
NEMB = 112
NHEAD = 2
HEADSIZ = NEMB // NHEAD  # 56  (proj expects headsiz * nhead == nemb)
HP = 64                  # head size padded to a 64-lane-aligned segment
DROPOUT = 0.3            # inference-mode identity (see TODOs)
NEG_INF = -1e30          # large finite negative for the causal mask (no NaN on masked rows)


# ---------------------------------------------------------------------------
# Fused kernel: proj output + all per-head causal attentions, one invocation.
# ---------------------------------------------------------------------------
def _fused_mha_kernel(x2_ref, wqkv_ref, wp_ref, bp_ref, out_ref, heads_ref):
    # x2_ref:    (B*T, C)            flattened input
    # wqkv_ref:  (C, 3*NHEAD*HP=384) columns = [q_h0|q_h1 | k_h0|k_h1 | v_h0|v_h1],
    #                                each segment zero-padded 56->64, 1/sqrt(56) folded into q
    # wp_ref:    (C, NEMB)           proj weight, pre-transposed to (in, out)
    # bp_ref:    (1, NEMB)           proj bias
    # out_ref:   (B*T, NEMB)         proj(x) + bias  -- the module's actual return value
    # heads_ref: (NHEAD*B, T, HP)    head-major attention outputs, lanes 56..63 are zero
    g, t, hp = heads_ref.shape
    bsz = g // NHEAD

    x2 = x2_ref[...]

    # ---- projection branch: this is what the module returns ------------------
    y = jnp.dot(x2, wp_ref[...], preferred_element_type=jnp.float32) + bp_ref[...]
    # TODO(synk): final nn.Dropout(0.3) modeled as inference-mode identity.
    out_ref[...] = y.astype(out_ref.dtype)

    # ---- head branch: one wide QKV matmul, then ONE batched attention --------
    qkv = jnp.dot(x2, wqkv_ref[...], preferred_element_type=jnp.float32)  # (B*T, 384)

    def head_batch(base):
        # columns [base, base + NHEAD*HP) hold [head0 | head1], each HP wide and
        # 64-lane aligned; leading-dim reshape + leading-axis concat only (no
        # lane->sublane relayout), producing head-major (NHEAD*B, T, HP).
        return jnp.concatenate(
            [qkv[:, base + h * HP: base + (h + 1) * HP].reshape(bsz, t, hp)
             for h in range(NHEAD)],
            axis=0)

    q = head_batch(0)              # scale pre-folded into the q weights
    k = head_batch(NHEAD * HP)     # 128
    v = head_batch(2 * NHEAD * HP) # 256

    row = lax.broadcasted_iota(jnp.int32, (g, t, t), 1)
    col = lax.broadcasted_iota(jnp.int32, (g, t, t), 2)
    causal = col <= row            # tril mask == 1

    s = jnp.einsum('gqd,gkd->gqk', q, k, preferred_element_type=jnp.float32)
    s = jnp.where(causal, s, NEG_INF)
    s = s - jnp.max(s, axis=-1, keepdims=True)
    p = jnp.exp(s)
    p = p / jnp.sum(p, axis=-1, keepdims=True)   # exact divide: full parity, EUP/VPU not the bottleneck
    # TODO(synk): nn.Dropout(0.3) on attention probabilities modeled as identity (eval mode).
    o = jnp.einsum('gqk,gkd->gqd', p, v, preferred_element_type=jnp.float32)  # (G, T, HP)
    heads_ref[...] = o.astype(heads_ref.dtype)    # single contiguous 64-lane-aligned store


# ---------------------------------------------------------------------------
# Wrappers
# ---------------------------------------------------------------------------
def _vmem():
    return pl.BlockSpec(memory_space=pltpu.MemorySpace.VMEM)


def prepare_params(params):
    """One-time, off-hot-path prep: fold 1/sqrt(headsiz) into the q weights, zero-pad
    each per-head q/k/v block from 56 to 64 columns, and stack into a single wide
    (C, 3*NHEAD*64) matrix so the q|k|v group boundaries land on 128-lane boundaries."""
    scale = float(HEADSIZ) ** (-0.5)
    pad = HP - HEADSIZ

    def pad_stack(w, s=1.0):  # (NHEAD, C, HEADSIZ) -> (C, NHEAD*HP)
        wp = jnp.pad(w * s, ((0, 0), (0, 0), (0, pad)))
        return jnp.concatenate([wp[h] for h in range(NHEAD)], axis=-1)

    wqkv = jnp.concatenate(
        [pad_stack(params["wq"], scale), pad_stack(params["wk"]), pad_stack(params["wv"])],
        axis=-1)  # (C, 384)
    return {"wqkv": wqkv, "wp": params["wp"], "bp": params["bp"]}


def multi_head_attention_forward(x, prep, with_heads=True):
    B, T, C = x.shape
    x2 = x.reshape(B * T, C)  # contiguous reshape -> free

    if not with_heads:
        # Production path: the module discards the head outputs, so the real forward is
        # just proj(x) (+ eval-mode dropout).  A few-hundred-ns GEMM is left to XLA —
        # no Pallas dispatch, and it can fuse with neighbouring ops.
        # TODO(synk): final nn.Dropout(0.3) modeled as inference-mode identity.
        out2 = jnp.dot(x2, prep["wp"], preferred_element_type=jnp.float32) + prep["bp"]
        return out2.astype(x.dtype).reshape(B, T, NEMB), None

    out2, heads_pad = pl.pallas_call(
        _fused_mha_kernel,
        out_shape=(jax.ShapeDtypeStruct((B * T, NEMB), x.dtype),
                   jax.ShapeDtypeStruct((NHEAD * B, T, HP), x.dtype)),
        in_specs=[_vmem(), _vmem(), _vmem(), _vmem()],
        out_specs=(_vmem(), _vmem()),
    )(x2, prep["wqkv"], prep["wp"], prep["bp"])
    heads = heads_pad[:, :, :HEADSIZ]  # drop the zero padding (cheap XLA slice, off the hot path)
    return out2.reshape(B, T, NEMB), heads


def init_params(key):
    ks = jax.random.split(key, 5)
    scale = 0.02
    return {
        # per-head linear weights (no bias), pre-transposed to (in, out)
        "wk": scale * jax.random.normal(ks[0], (NHEAD, NEMB, HEADSIZ), jnp.float32),
        "wq": scale * jax.random.normal(ks[1], (NHEAD, NEMB, HEADSIZ), jnp.float32),
        "wv": scale * jax.random.normal(ks[2], (NHEAD, NEMB, HEADSIZ), jnp.float32),
        # proj: Linear(headsiz*nhead=112 -> nemb=112), pre-transposed to (in, out)
        "wp": scale * jax.random.normal(ks[3], (HEADSIZ * NHEAD, NEMB), jnp.float32),
        "bp": scale * jax.random.normal(ks[4], (1, NEMB), jnp.float32),
    }


if __name__ == "__main__":
    key = jax.random.PRNGKey(0)
    kx, kp = jax.random.split(key)

    B, T = 2, 8                       # small shapes; T <= blocksiz (128)
    x = jax.random.normal(kx, (B, T, NEMB), dtype=jnp.float32)
    params = init_params(kp)
    prep = prepare_params(params)

    fwd = jax.jit(multi_head_attention_forward, static_argnames=("with_heads",))

    out, heads = fwd(x, prep, with_heads=True)      # fused Pallas kernel (parity path)
    out = jax.block_until_ready(out)
    heads = jax.block_until_ready(heads)

    out_fast, _ = fwd(x, prep, with_heads=False)    # production path: pure XLA, no dispatch
    out_fast = jax.block_until_ready(out_fast)

    # ---- pure-JAX references -------------------------------------------------
    ref_out = jnp.einsum("btc,cn->btn", x, params["wp"]) + params["bp"][0]

    def ref_head(h):
        k = x @ params["wk"][h]
        q = x @ params["wq"][h]
        v = x @ params["wv"][h]
        w = (q @ jnp.swapaxes(k, -2, -1)) * (HEADSIZ ** -0.5)
        mask = jnp.tril(jnp.ones((T, T), bool))
        w = jnp.where(mask, w, -jnp.inf)
        w = jax.nn.softmax(w, axis=-1)
        return w @ v

    ref_heads = jnp.concatenate([ref_head(h) for h in range(NHEAD)], axis=0)

    assert out.shape == (B, T, NEMB)
    assert heads.shape == (NHEAD * B, T, HEADSIZ)
    assert jnp.allclose(out, ref_out, atol=1e-5, rtol=1e-5)
    assert jnp.allclose(out_fast, ref_out, atol=1e-5, rtol=1e-5)
    # exact softmax divide now -> tight tolerance (only MXU accumulation order + folded scale differ)
    assert jnp.allclose(heads, ref_heads, atol=1e-4, rtol=1e-4)

    print("KERNEL_OK")
</pallas_src>

<mosaic_0001>
module attributes {stable_mosaic.version = 11 : i64} {
  func.func @_fused_mha_kernel(%arg0: memref<16x112xf32, #tpu.memory_space<vmem>>, %arg1: memref<112x384xf32, #tpu.memory_space<vmem>>, %arg2: memref<112x112xf32, #tpu.memory_space<vmem>>, %arg3: memref<1x112xf32, #tpu.memory_space<vmem>>, %arg4: memref<16x112xf32, #tpu.memory_space<vmem>>, %arg5: memref<4x8x64xf32, #tpu.memory_space<vmem>>) attributes {dimension_semantics = [], scalar_prefetch = 0 : i64, scratch_operands = 0 : i64, tpu.core_type = #tpu.core_type<tc>} {
    %c0 = arith.constant 0 : index
    %c0_0 = arith.constant 0 : index
    %0 = vector.load %arg0[%c0, %c0_0] : memref<16x112xf32, #tpu.memory_space<vmem>>, vector<16x112xf32>
    %c0_1 = arith.constant 0 : index
    %c0_2 = arith.constant 0 : index
    %1 = vector.load %arg2[%c0_1, %c0_2] : memref<112x112xf32, #tpu.memory_space<vmem>>, vector<112x112xf32>
    %cst = arith.constant dense<0.000000e+00> : vector<16x112xf32>
    %2 = tpu.matmul %0, %1, %cst {dimension_numbers = #tpu.dot_dimension_numbers<[1], [0], [0], [1], [0, 0, 1, 1], [], []>} : vector<16x112xf32>, vector<112x112xf32>, vector<16x112xf32> -> vector<16x112xf32>
    %c0_3 = arith.constant 0 : index
    %c0_4 = arith.constant 0 : index
    %3 = vector.load %arg3[%c0_3, %c0_4] : memref<1x112xf32, #tpu.memory_space<vmem>>, vector<1x112xf32>
    %4 = vector.broadcast %3 : vector<1x112xf32> to vector<16x112xf32>
    %5 = arith.addf %2, %4 : vector<16x112xf32>
    %c0_5 = arith.constant 0 : index
    %c0_6 = arith.constant 0 : index
    %6 = vector.load %arg4[%c0_5, %c0_6] : memref<16x112xf32, #tpu.memory_space<vmem>>, vector<16x112xf32>
    tpu.vector_store %arg4[%c0_5, %c0_6], %5 {strides = array<i32>} : memref<16x112xf32, #tpu.memory_space<vmem>>, vector<16x112xf32>,
    %c0_7 = arith.constant 0 : index
    %c0_8 = arith.constant 0 : index
    %7 = vector.load %arg1[%c0_7, %c0_8] : memref<112x384xf32, #tpu.memory_space<vmem>>, vector<112x384xf32>
    %cst_9 = arith.constant dense<0.000000e+00> : vector<16x384xf32>
    %8 = tpu.matmul %0, %7, %cst_9 {dimension_numbers = #tpu.dot_dimension_numbers<[1], [0], [0], [1], [0, 0, 1, 1], [], []>} : vector<16x112xf32>, vector<112x384xf32>, vector<16x384xf32> -> vector<16x384xf32>
    %9 = vector.extract_strided_slice %8 {offsets = [0, 0], sizes = [16, 64], strides = [1, 1]} : vector<16x384xf32> to vector<16x64xf32>
    %10 = vector.shape_cast %9 : vector<16x64xf32> to vector<2x8x64xf32>
    %11 = vector.extract_strided_slice %8 {offsets = [0, 64], sizes = [16, 64], strides = [1, 1]} : vector<16x384xf32> to vector<16x64xf32>
    %12 = vector.shape_cast %11 : vector<16x64xf32> to vector<2x8x64xf32>
    %13 = tpu.concatenate %10, %12 in 0 : vector<2x8x64xf32>, vector<2x8x64xf32> -> vector<4x8x64xf32>
    %14 = vector.extract_strided_slice %8 {offsets = [0, 128], sizes = [16, 64], strides = [1, 1]} : vector<16x384xf32> to vector<16x64xf32>
    %15 = vector.shape_cast %14 : vector<16x64xf32> to vector<2x8x64xf32>
    %16 = vector.extract_strided_slice %8 {offsets = [0, 192], sizes = [16, 64], strides = [1, 1]} : vector<16x384xf32> to vector<16x64xf32>
    %17 = vector.shape_cast %16 : vector<16x64xf32> to vector<2x8x64xf32>
    %18 = tpu.concatenate %15, %17 in 0 : vector<2x8x64xf32>, vector<2x8x64xf32> -> vector<4x8x64xf32>
    %19 = vector.extract_strided_slice %8 {offsets = [0, 256], sizes = [16, 64], strides = [1, 1]} : vector<16x384xf32> to vector<16x64xf32>
    %20 = vector.shape_cast %19 : vector<16x64xf32> to vector<2x8x64xf32>
    %21 = vector.extract_strided_slice %8 {offsets = [0, 320], sizes = [16, 64], strides = [1, 1]} : vector<16x384xf32> to vector<16x64xf32>
    %22 = vector.shape_cast %21 : vector<16x64xf32> to vector<2x8x64xf32>
    %23 = tpu.concatenate %20, %22 in 0 : vector<2x8x64xf32>, vector<2x8x64xf32> -> vector<4x8x64xf32>
    %24 = tpu.iota {dimensions = array<i32: 1>} : vector<4x8x8xi32>
    %25 = tpu.iota {dimensions = array<i32: 2>} : vector<4x8x8xi32>
    %26 = arith.cmpi sle, %25, %24 : vector<4x8x8xi32>
    "tpu.trace_start"() <{level = 10 : i32, message = "gqd,gkd->gqk"}> : () -> ()
    %cst_10 = arith.constant dense<0.000000e+00> : vector<4x8x8xf32>
    %27 = tpu.matmul %13, %18, %cst_10 {dimension_numbers = #tpu.dot_dimension_numbers<[2], [2], [1], [1], [0, 0, 0, 1, 1, 1], [0], [0]>} : vector<4x8x64xf32>, vector<4x8x64xf32>, vector<4x8x8xf32> -> vector<4x8x8xf32>
    %cst_11 = arith.constant -1.000000e+30 : f32
    "tpu.trace_stop"() : () -> ()
    %28 = vector.broadcast %cst_11 : f32 to vector<4x8x8xf32>
    %29 = arith.select %26, %27, %28 : vector<4x8x8xi1>, vector<4x8x8xf32>
    %cst_12 = arith.constant dense<0xFF800000> : vector<4x8xf32>
    %30 = vector.multi_reduction <maximumf>, %29, %cst_12 [2] : vector<4x8x8xf32> to vector<4x8xf32>
    %31 = vector.shape_cast %30 : vector<4x8xf32> to vector<4x8x1xf32>
    %32 = vector.broadcast %31 : vector<4x8x1xf32> to vector<4x8x8xf32>
    %33 = arith.subf %29, %32 : vector<4x8x8xf32>
    %34 = math.exp %33 : vector<4x8x8xf32>
    %cst_13 = arith.constant dense<0.000000e+00> : vector<4x8xf32>
    %35 = vector.multi_reduction <add>, %34, %cst_13 [2] : vector<4x8x8xf32> to vector<4x8xf32>
    %36 = vector.shape_cast %35 : vector<4x8xf32> to vector<4x8x1xf32>
    %37 = vector.broadcast %36 : vector<4x8x1xf32> to vector<4x8x8xf32>
    %38 = arith.divf %34, %37 : vector<4x8x8xf32>
    "tpu.trace_start"() <{level = 10 : i32, message = "gqk,gkd->gqd"}> : () -> ()
    %cst_14 = arith.constant dense<0.000000e+00> : vector<4x8x64xf32>
    %39 = tpu.matmul %38, %23, %cst_14 {dimension_numbers = #tpu.dot_dimension_numbers<[2], [1], [1], [2], [0, 0, 0, 1, 1, 2], [0], [0]>} : vector<4x8x8xf32>, vector<4x8x64xf32>, vector<4x8x64xf32> -> vector<4x8x64xf32>
    "tpu.trace_stop"() : () -> ()
    %c0_15 = arith.constant 0 : index
    %c0_16 = arith.constant 0 : index
    %c0_17 = arith.constant 0 : index
    %40 = vector.load %arg5[%c0_15, %c0_16, %c0_17] : memref<4x8x64xf32, #tpu.memory_space<vmem>>, vector<4x8x64xf32>
    tpu.vector_store %arg5[%c0_15, %c0_16, %c0_17], %39 {strides = array<i32>} : memref<4x8x64xf32, #tpu.memory_space<vmem>>, vector<4x8x64xf32>,
    return
  }
}

</mosaic_0001>

<bundles_post_ra>
// kernel: multi_head_attention_forward.1
= control target key start
LH: loop header
LB: loop body
LE: loop exit
PB: predicated region body
PF: predicated region fallthrough
CT: control target
= control target key end

     0   :  { %11 = vsyncpa [#allocation3], 0  ;;  %s1519_s0 = inlined_call_operand.hbm [shape: f32[16,112], index: 0, kind: input, shape index: {}]   ;;  %s1520_s1 = inlined_call_operand.hbm [shape: f32[112,384], index: 1, kind: input, shape index: {}]   ;;  %s1521_s2 = inlined_call_operand.hbm [shape: f32[112,112], index: 2, kind: input, shape index: {}]   ;;  %s1522_s3 = inlined_call_operand.vmem [shape: f32[1,112], index: 3, kind: input, shape index: {}]   ;;  %s1523_s4 = inlined_call_operand.hbm [shape: f32[16,112], index: 4, kind: output, shape index: {0}]   ;;  %s1524_s5 = inlined_call_operand.hbm [shape: f32[4,8,64], index: 5, kind: output, shape index: {1}]  }
   0x1   :  { %12 = vsyncpa [#allocation6], 0 }
   0x2   :  { %13 = vsyncpa [#allocation4], 0 }
   0x3   :  { %14 = vsyncpa [#allocation10], 0  ;;  %s1369_s18 = smov [#allocation5]  }
   0x4   :  { %s32_s19 = sshll.u32 %s1369_s18, 4  ;;  %s33_s19 = int_to_ptr.vmem [resolvable:$true] %s32_s19 }
   0x5   :  { %s1269_s20 = scalar_lea.vmem %s33_s19, 5376  ;;  %p1274_p1 = scmp.lt.s32.totalorder %s33_s19, %s33_s19 }
   0x6   :  { %p1270_p0 = scmp.ne.s32.totalorder %s33_s19, %s1269_s20  ;;  %p1275_p2 = scmp.lt.s32.totalorder %s1269_s20, %s1269_s20 }
   0x8   :  { %p1276_p3 = por %p1275_p2, %p1274_p1 }
   0xa   :  { %p1277_p4 = pnand %p1276_p3, %p1270_p0 }
   0xc   :  { %1280 = shalt.err (!%p1277_p4)
}
   0xd   :  { %s1370_s21 = smov 384   ;;  %s1371_s22 = smov 24  }
   0xe   :  { %38 = dma.hbm_to_vmem [thread:$0]  %s1520_s1, 5376, %s33_s19, [#allocation6], %s1370_s21, %s1370_s21, %s1371_s22  }
   0xf   :  { %s1372_s25 = smov [#allocation2]  }
  0x10   :  { %s20_s26 = sshll.u32 %s1372_s25, 4  ;;  %s21_s26 = int_to_ptr.vmem [resolvable:$true] %s20_s26 }
  0x11   :  { %s1289_s27 = scalar_lea.vmem %s21_s26, 256  ;;  %p1294_p6 = scmp.lt.s32.totalorder %s21_s26, %s21_s26 }
  0x12   :  { %p1290_p5 = scmp.ne.s32.totalorder %s21_s26, %s1289_s27  ;;  %p1295_p7 = scmp.lt.s32.totalorder %s1289_s27, %s1289_s27 }
  0x14   :  { %p1296_p8 = por %p1295_p7, %p1294_p6 }
  0x16   :  { %p1297_p9 = pnand %p1296_p8, %p1290_p5 }
  0x18   :  { %1300 = shalt.err (!%p1297_p9)
}
  0x19   :  { %s1373_s28 = smov 128   ;;  %s1374_s29 = smov 8  }
  0x1a   :  { %26 = dma.hbm_to_vmem [thread:$0]  %s1519_s0, 256, %s21_s26, [#allocation3], %s1373_s28, %s1373_s28, %s1374_s29  }
  0x1b   :  { %s1375_s1 = smov [#allocation7]  }
  0x1c   :  { %s44_s7 = sshll.u32 %s1375_s1, 4  ;;  %s45_s7 = int_to_ptr.vmem [resolvable:$true] %s44_s7 }
  0x1d   :  { %s1309_s8 = scalar_lea.vmem %s45_s7, 1792  ;;  %p1314_p11 = scmp.lt.s32.totalorder %s45_s7, %s45_s7 }
  0x1e   :  { %p1310_p10 = scmp.ne.s32.totalorder %s45_s7, %s1309_s8  ;;  %p1315_p12 = scmp.lt.s32.totalorder %s1309_s8, %s1309_s8 }
  0x20   :  { %p1316_p13 = por %p1315_p12, %p1314_p11 }
  0x22   :  { %p1317_p0 = pnand %p1316_p13, %p1310_p10 }
  0x24   :  { %1320 = shalt.err (!%p1317_p0)
}
  0x25   :  { %50 = dma.hbm_to_vmem [thread:$0]  %s1521_s2, 1792, %s45_s7, [#allocation6], %s1373_s28, %s1373_s28, %s1374_s29  }
  0x26   :  { %1361 = dma.done.wait [#allocation3], 256  }
  0x27   :  { %1362 = vsyncadd [#allocation3], 4294967040 }
  0x28   :  { %1363 = dma.done.wait [#allocation6], 7168  }
  0x29   :  { %1364 = vsyncadd [#allocation6], 4294960128  ;;  %v1376_v0 = vmov 0.0   ;;  %v209_v1 = vld [vmem:[#allocation5 + $0x140] sm:$0xff]  ;;  %v208_v2 = vld [vmem:[#allocation5 + $0x138] sm:$0xff]  ;;  %vm85_vm0 = vcmask 916480  }
  0x2a   :  { %275 = vmatprep.mubr.f32.mxu1 %v1376_v0  ;;  %v206_v3 = vld [vmem:[#allocation5 + $0x128] sm:$0xff]  ;;  %215 = vmatprep.subr.mxu1 %v209_v1  ;;  %v205_v4 = vld [vmem:[#allocation5 + $0x120] sm:$0xff]  ;;  %v203_v5 = vld [vmem:[#allocation5 + $0x110] sm:$0xff]  ;;  %vm1377_vm1 = vmmov 0   ;;  %vm388_vm2 = vcmask 523264   ;;  %s1378_s0 = smov 64  }
  0x2b   :  { %216 = vmatpush1.msra.mxu1 %v208_v2  ;;  %v202_v6 = vld [vmem:[#allocation5 + $0x108] sm:$0xff]  ;;  %v200_v7 = vld [vmem:[#allocation5 + $0xf8] sm:$0xff]  ;;  %v199_v8 = vld [vmem:[#allocation5 + $0xf0] sm:$0xff]  ;;  %vm689_vm4 = vcmask 64512  }
  0x2c   :  { %217 = vmatprep.subr.mxu1 %v206_v3  ;;  %v197_v9 = vld [vmem:[#allocation5 + $0xe0] sm:$0xff]  ;;  %v196_v10 = vld [vmem:[#allocation5 + $0xd8] sm:$0xff]  ;;  %v194_v11 = vld [vmem:[#allocation5 + $0xc8] sm:$0xff] }
  0x2d   :  { %218 = vmatpush1.msra.mxu1 %v205_v4  ;;  %v193_v12 = vld [vmem:[#allocation5 + $0xc0] sm:$0xff]  ;;  %v1427_v13 = vld [vmem:[#allocation2] sm:$0xff]  ;;  %v190_v15 = vld [vmem:[#allocation5 + $0xa8] sm:$0xff]  ;;  %v383_v4 = vlaneseq }
  0x2e   :  { %219 = vmatprep.subr.mxu1 %v203_v5  ;;  %v191_v14 = vld [vmem:[#allocation5 + $0xb0] sm:$0xff]  ;;  %1159 = vmatprep.mubr.msk.f32.mxu0 %vm85_vm0, %v1427_v13  ;;  %v188_v16 = vld [vmem:[#allocation5 + $0x98] sm:$0xff]  ;;  %v185_v18 = vld [vmem:[#allocation5 + $0x80] sm:$0xff] }
  0x2f   :  { %220 = vmatpush1.msra.mxu1 %v202_v6  ;;  %v187_v17 = vld [vmem:[#allocation5 + $0x90] sm:$0xff]  ;;  %v184_v19 = vld [vmem:[#allocation5 + $0x78] sm:$0xff]  ;;  %v182_v20 = vld [vmem:[#allocation5 + $0x68] sm:$0xff]  ;;  %v384_v5 = vshrl.u32 %v383_v4, 7  ;;  %v386_v6 = vand.u32 127, %v383_v4 }
  0x30   :  { %221 = vmatprep.subr.mxu1 %v200_v7  ;;  %v181_v21 = vld [vmem:[#allocation5 + $0x60] sm:$0xff]  ;;  %v179_v22 = vld [vmem:[#allocation5 + $0x50] sm:$0xff]  ;;  %v178_v23 = vld [vmem:[#allocation5 + $0x48] sm:$0xff] }
  0x31   :  { %222 = vmatpush1.msra.mxu1 %v199_v8  ;;  %v176_v24 = vld [vmem:[#allocation5 + $0x38] sm:$0xff]  ;;  %v175_v25 = vld [vmem:[#allocation5 + $0x30] sm:$0xff]  ;;  %v173_v26 = vld [vmem:[#allocation5 + $0x20] sm:$0xff]  ;;  %vm387_vm3 = vcmp.le.s32.totalorder %v386_v6, %v384_v5 }
  0x32   :  { %223 = vmatprep.subr.mxu1 %v197_v9  ;;  %v172_v27 = vld [vmem:[#allocation5 + $0x18] sm:$0xff]  ;;  %v170_v28 = vld [vmem:[#allocation5 + $0x8] sm:$0xff]  ;;  %v169_v29 = vld [vmem:[#allocation5] sm:$0xff] }
  0x33   :  { %224 = vmatpush1.msra.mxu1 %v196_v10  ;;  %v1435_v30 = vld [vmem:[#allocation2 + $0x8] sm:$0xff]  ;;  %v76_v36 = vld [vmem:[#allocation7 + $0x60] sm:$0xff]  ;;  %v75_v37 = vld [vmem:[#allocation7 + $0x58] sm:$0xff] }
  0x34   :  { %225 = vmatprep.subr.mxu1 %v194_v11  ;;  %v77_v35 = vld [vmem:[#allocation7 + $0x68] sm:$0xff]  ;;  %v74_v38 = vld [vmem:[#allocation7 + $0x50] sm:$0xff]  ;;  %v72_v40 = vld [vmem:[#allocation7 + $0x40] sm:$0xff] }
  0x35   :  { %226 = vmatpush1.msra.mxu1 %v193_v12  ;;  %1131 = vmatprep.subr.mxu0 %v77_v35  ;;  %v73_v39 = vld [vmem:[#allocation7 + $0x48] sm:$0xff]  ;;  %v71_v41 = vld [vmem:[#allocation7 + $0x38] sm:$0xff]  ;;  %v70_v42 = vld [vmem:[#allocation7 + $0x30] sm:$0xff] }
  0x36   :  { %227 = vmatprep.subr.mxu1 %v191_v14  ;;  %1132 = vmatpush3.msra.mxu0 %v77_v35  ;;  %v69_v43 = vld [vmem:[#allocation7 + $0x28] sm:$0xff]  ;;  %v68_v44 = vld [vmem:[#allocation7 + $0x20] sm:$0xff]  ;;  %v67_v45 = vld [vmem:[#allocation7 + $0x18] sm:$0xff] }
  0x37   :  { %228 = vmatpush1.msra.mxu1 %v190_v15  ;;  %1133 = vmatprep.subr.mxu0 %v76_v36  ;;  %v66_v46 = vld [vmem:[#allocation7 + $0x10] sm:$0xff]  ;;  %v65_v47 = vld [vmem:[#allocation7 + $0x8] sm:$0xff]  ;;  %v64_v48 = vld [vmem:[#allocation7] sm:$0xff] }
  0x38   :  { %229 = vmatprep.subr.mxu1 %v188_v16  ;;  %1134 = vmatpush3.msra.mxu0 %v76_v36  ;;  %v210_v49 = vld [vmem:[#allocation5 + $0x148] sm:$0xff]  ;;  %v207_v50 = vld [vmem:[#allocation5 + $0x130] sm:$0xff]  ;;  %v204_v51 = vld [vmem:[#allocation5 + $0x118] sm:$0xff] }
  0x39   :  { %230 = vmatpush1.msra.mxu1 %v187_v17  ;;  %1135 = vmatprep.subr.mxu0 %v75_v37  ;;  %v201_v52 = vld [vmem:[#allocation5 + $0x100] sm:$0xff]  ;;  %v198_v53 = vld [vmem:[#allocation5 + $0xe8] sm:$0xff]  ;;  %v195_v54 = vld [vmem:[#allocation5 + $0xd0] sm:$0xff] }
  0x3a   :  { %231 = vmatprep.subr.mxu1 %v185_v18  ;;  %1136 = vmatpush3.msra.mxu0 %v75_v37  ;;  %v192_v55 = vld [vmem:[#allocation5 + $0xb8] sm:$0xff]  ;;  %v189_v57 = vld [vmem:[#allocation5 + $0xa0] sm:$0xff]  ;;  %v186_v60 = vld [vmem:[#allocation5 + $0x88] sm:$0xff] }
  0x3b   :  { %232 = vmatpush1.msra.mxu1 %v184_v19  ;;  %1137 = vmatprep.subr.mxu0 %v74_v38  ;;  %v183_v61 = vld [vmem:[#allocation5 + $0x70] sm:$0xff]  ;;  %v180_v63 = vld [vmem:[#allocation5 + $0x58] sm:$0xff]  ;;  %v177_v1 = vld [vmem:[#allocation5 + $0x40] sm:$0xff] }
  0x3c   :  { %233 = vmatprep.subr.mxu1 %v182_v20  ;;  %1138 = vmatpush3.msra.mxu0 %v74_v38  ;;  %v174_v2 = vld [vmem:[#allocation5 + $0x28] sm:$0xff]  ;;  %v171_v3 = vld [vmem:[#allocation5 + $0x10] sm:$0xff] }
  0x3d   :  { %234 = vmatpush1.msra.mxu1 %v181_v21  ;;  %1139 = vmatprep.subr.mxu0 %v73_v39 }
  0x3e   :  { %235 = vmatprep.subr.mxu1 %v179_v22  ;;  %1140 = vmatpush3.msra.mxu0 %v73_v39 }
  0x3f   :  { %236 = vmatpush1.msra.mxu1 %v178_v23  ;;  %1141 = vmatprep.subr.mxu0 %v72_v40 }
  0x40   :  { %237 = vmatprep.subr.mxu1 %v176_v24  ;;  %1142 = vmatpush3.msra.mxu0 %v72_v40 }
  0x41   :  { %238 = vmatpush1.msra.mxu1 %v175_v25  ;;  %1143 = vmatprep.subr.mxu0 %v71_v41 }
  0x42   :  { %239 = vmatprep.subr.mxu1 %v173_v26  ;;  %1144 = vmatpush3.msra.mxu0 %v71_v41 }
  0x43   :  { %240 = vmatpush1.msra.mxu1 %v172_v27  ;;  %1145 = vmatprep.subr.mxu0 %v70_v42 }
  0x44   :  { %241 = vmatprep.subr.mxu1 %v170_v28  ;;  %1146 = vmatpush3.msra.mxu0 %v70_v42 }
  0x45   :  { %242 = vmatpush1.msra.mxu1 %v169_v29  ;;  %1147 = vmatprep.subr.mxu0 %v69_v43 }
  0x46   :  { %1067 = vmatmul.mubr.msk.f32.vlgmr.msra.gmra.mxu1 %vm85_vm0, %v1427_v13  ;;  %1193 = vmatprep.subr.mxu1 %v1376_v0 }
  0x47   :  { %281 = vmatprep.mubr.f32.mxu1 %v1376_v0  ;;  %1148 = vmatpush3.msra.mxu0 %v69_v43 }
  0x48   :  { %1149 = vmatprep.subr.mxu0 %v68_v44 }
  0x49   :  { %1150 = vmatpush3.msra.mxu0 %v68_v44 }
  0x4a   :  { %1068 = vmatmul.mubr.msk.f32.gmra.mxu1 %vm85_vm0, %v1435_v30  ;;  %1151 = vmatprep.subr.mxu0 %v67_v45 }
  0x4b   :  { %1195 = vmatprep.mubr.msk.f32.mxu1 %vm1377_vm1, %v1376_v0  ;;  %1152 = vmatpush3.msra.mxu0 %v67_v45 }
  0x4c   :  { %1153 = vmatprep.subr.mxu0 %v66_v46 }
  0x4d   :  { %1154 = vmatpush3.msra.mxu0 %v66_v46 }
  0x4e   :  { %1155 = vmatprep.subr.mxu0 %v65_v47 }
  0x4f   :  { %1156 = vmatpush3.msra.mxu0 %v65_v47 }
  0x50   :  { %1157 = vmatprep.subr.mxu0 %v64_v48 }
  0x51   :  { %1158 = vmatpush3.msra.mxu0 %v64_v48 }
  0x52   :  { %1162 = vmatprep.subr.mxu0 %v210_v49  ;;  %1160 = vmatmul.mubr.msk.f32.vlgmr.msra.gmra.mxu0 %vm85_vm0, %v1435_v30 }
  0x53   :  { %1163 = vmatpush3.msra.mxu0 %v210_v49  ;;  %1190 = vmatprep.mubr.msk.f32.mxu0 %vm85_vm0, %v1427_v13 }
  0x54   :  { %1164 = vmatprep.subr.mxu0 %v207_v50 }
  0x55   :  { %1165 = vmatpush3.msra.mxu0 %v207_v50 }
  0x56   :  { %1166 = vmatprep.subr.mxu0 %v204_v51 }
  0x57   :  { %1167 = vmatpush3.msra.mxu0 %v204_v51 }
  0x58   :  { %1168 = vmatprep.subr.mxu0 %v201_v52 }
  0x59   :  { %1169 = vmatpush3.msra.mxu0 %v201_v52 }
  0x5a   :  { %1170 = vmatprep.subr.mxu0 %v198_v53 }
  0x5b   :  { %1171 = vmatpush3.msra.mxu0 %v198_v53 }
  0x5c   :  { %1172 = vmatprep.subr.mxu0 %v195_v54 }
  0x5d   :  { %1173 = vmatpush3.msra.mxu0 %v195_v54 }
  0x5e   :  { %1174 = vmatprep.subr.mxu0 %v192_v55 }
  0x5f   :  { %1175 = vmatpush3.msra.mxu0 %v192_v55 }
  0x60   :  { %1176 = vmatprep.subr.mxu0 %v189_v57 }
  0x61   :  { %1177 = vmatpush3.msra.mxu0 %v189_v57 }
  0x62   :  { %1178 = vmatprep.subr.mxu0 %v186_v60 }
  0x63   :  { %1179 = vmatpush3.msra.mxu0 %v186_v60 }
  0x64   :  { %1180 = vmatprep.subr.mxu0 %v183_v61 }
  0x65   :  { %1181 = vmatpush3.msra.mxu0 %v183_v61 }
  0x66   :  { %1182 = vmatprep.subr.mxu0 %v180_v63 }
  0x67   :  { %1183 = vmatpush3.msra.mxu0 %v180_v63 }
  0x68   :  { %1184 = vmatprep.subr.mxu0 %v177_v1 }
  0x69   :  { %1185 = vmatpush3.msra.mxu0 %v177_v1 }
  0x6a   :  { %1186 = vmatprep.subr.mxu0 %v174_v2 }
  0x6b   :  { %1187 = vmatpush3.msra.mxu0 %v174_v2 }
  0x6c   :  { %1188 = vmatprep.subr.mxu0 %v171_v3 }
  0x6d   :  { %1189 = vmatpush3.msra.mxu0 %v171_v3 }
  0x6e   :  { %1191 = vmatmul.mubr.msk.f32.vlgmr.msra.gmra.mxu0 %vm85_vm0, %v1435_v30  ;;  %1223 = vmatprep.subr.mxu0 %v1376_v0  ;;  %v1064_v30 = vld [vmem:[%s1522_s3] ss:$0 sm:$0xff]  ;;  %s1379_s3 = smov [#allocation8]  }
  0x6f   :  { %1225 = vmatprep.mubr.msk.f32.mxu0 %vm1377_vm1, %v1376_v0  ;;  %s1035_s12 = sshll.u32 %s1379_s3, 4  ;;  %s1036_s12 = int_to_ptr.vmem [resolvable:$true] %s1035_s12 }
  0x70   :  { %s1321_s13 = scalar_lea.vmem %s1036_s12, 256  ;;  %p1326_p2 = scmp.lt.s32.totalorder %s1036_s12, %s1036_s12 }
  0x71   :  { %p1322_p1 = scmp.ne.s32.totalorder %s1036_s12, %s1321_s13  ;;  %p1327_p3 = scmp.lt.s32.totalorder %s1321_s13, %s1321_s13 }
  0x73   :  { %p1328_p4 = por %p1327_p3, %p1326_p2 }
  0x75   :  { %p1329_p5 = pnand %p1328_p4, %p1322_p1 }
 0x106   :  { %v277_v31 = vpop.f32.mrf.mxu1 }
 0x108   :  { %v279_v32 = vpop.f32.mrf.mxu1 }
 0x109   :  { %371 = vrot.lane.b32.xlu0 %v279_v32, %s1378_s0  ;;  %1194 = vmatpush3.xpose.msk.msra.mxu1 %vm388_vm2, %v279_v32 }
 0x10a   :  { %v283_v33 = vpop.f32.mrf.mxu1  ;;  %1198 = vmatprep.subr.mxu1 %v1376_v0 }
 0x10c   :  { %v285_v34 = vpop.f32.mrf.mxu1  ;;  %1196 = vmatmul.mubr.msk.f32.vlgmr.msra.gmra.mxu1 %vm388_vm2, %v277_v31 }
 0x10d   :  { %365 = vrot.lane.b32.xlu0 %v277_v31, %s1378_s0  ;;  %373 = vrot.lane.b32.xlu1 %v285_v34, %s1378_s0 }
 0x10e   :  { %1199 = vmatpush3.xpose.msk.msra.mxu1 %vm388_vm2, %v285_v34  ;;  %1200 = vmatprep.mubr.msk.f32.mxu1 %vm1377_vm1, %v1376_v0 }
 0x10f   :  { %1203 = vmatprep.subr.mxu1 %v1376_v0 }
 0x111   :  { %1201 = vmatmul.mubr.msk.f32.vlgmr.msra.gmra.mxu1 %vm388_vm2, %v283_v33  ;;  %367 = vrot.lane.b32.xlu1 %v283_v33, %s1378_s0 }
 0x112   :  { %1205 = vmatprep.mubr.msk.f32.mxu1 %vm1377_vm1, %v1376_v0  ;;  %v1161_v29 = vpop.f32.mrf.mxu0 }
 0x113   :  { %v164_v31 = vadd.f32 %v1161_v29, %v1064_v30 }
 0x114   :  { %v158_v32 = vpop.f32.mrf.mxu0 }
 0x115   :  { %168 = vst.msk [vmem:[#allocation8 + $0x8] sm:$0xff] %vm85_vm0, %v164_v31  ;;  %v159_v33 = vadd.f32 %v1064_v30, %v158_v32 }
 0x117   :  { %167 = vst.msk [vmem:[#allocation8] sm:$0xff] %vm85_vm0, %v159_v33 }
 0x12e   :  { %v1192_v38 = vpop.f32.mrf.mxu0 }
 0x130   :  { %v354_v39 = vpop.f32.mrf.mxu0 }
 0x17b   :  { %v372_v56 = vpop.permute.xlu0 %371 }
 0x17c   :  { %1204 = vmatpush3.xpose.msk.msra.mxu1 %vm388_vm2, %v372_v56 }
 0x17d   :  { %1208 = vmatprep.subr.mxu1 %v1376_v0 }
 0x17f   :  { %v366_v58 = vpop.permute.xlu0 %365  ;;  %v374_v59 = vpop.permute.xlu1 %373 }
 0x180   :  { %1206 = vmatmul.mubr.msk.f32.vlgmr.msra.gmra.mxu1 %vm388_vm2, %v366_v58 }
 0x181   :  { %1209 = vmatpush3.xpose.msk.msra.mxu1 %vm388_vm2, %v374_v59  ;;  %1210 = vmatprep.mubr.msk.f32.mxu1 %vm1377_vm1, %v1376_v0 }
 0x182   :  { %1213 = vmatprep.subr.mxu1 %v1376_v0 }
 0x183   :  { %v368_v62 = vpop.permute.xlu1 %367 }
 0x184   :  { %1211 = vmatmul.mubr.msk.f32.vlgmr.msra.gmra.mxu1 %vm388_vm2, %v368_v62 }
 0x185   :  { %1215 = vmatprep.mubr.msk.f32.mxu1 %vm1377_vm1, %v1376_v0  ;;  %1214 = vmatpush3.msra.mxu1 %v354_v39 }
 0x186   :  { %1218 = vmatprep.subr.mxu1 %v1376_v0 }
 0x1cc   :  { %v459_v7 = vpop.f32.mrf.mxu1 }
 0x1cd   :  { %v685_v8 = vsel %vm387_vm3, %v459_v7, -1e+30 }
 0x1ce   :  { %v1197_v9 = vpop.f32.mrf.mxu1  ;;  %v690_v10 = vsel %vm689_vm4, %v685_v8, -inf }
 0x1cf   :  { %691 = vmax.xlane.f32.xlu0 %v690_v10 }
 0x1d1   :  { %v533_v11 = vpop.f32.mrf.mxu1 }
 0x1d2   :  { %v686_v12 = vsel %vm387_vm3, %v533_v11, -1e+30 }
 0x1d3   :  { %v1202_v13 = vpop.f32.mrf.mxu1  ;;  %v693_v14 = vsel %vm689_vm4, %v686_v12, -inf }
 0x1d4   :  { %694 = vmax.xlane.f32.xlu1 %v693_v14 }
 0x240   :  { %v607_v15 = vpop.f32.mrf.mxu1 }
 0x241   :  { %v687_v16 = vsel %vm387_vm3, %v607_v15, -1e+30 }
 0x242   :  { %v1207_v17 = vpop.f32.mrf.mxu1  ;;  %v696_v18 = vsel %vm689_vm4, %v687_v16, -inf }
 0x243   :  { %697 = vmax.xlane.f32.xlu0 %v696_v18 }
 0x244   :  { %v681_v19 = vpop.f32.mrf.mxu1 }
 0x245   :  { %v688_v20 = vsel %vm387_vm3, %v681_v19, -1e+30 }
 0x246   :  { %v1212_v21 = vpop.f32.mrf.mxu1  ;;  %v699_v22 = vsel %vm689_vm4, %v688_v20, -inf }
 0x247   :  { %700 = vmax.xlane.f32.xlu0 %v699_v22 }
 0x258   :  { %v692_v23 = vpop.xlane.xlu0 %691 }
 0x259   :  { %v702_v24 = vsub.f32 %v685_v8, %v692_v23 }
 0x25b   :  { %v706_v25 = vmul.f32 1.442695, %v702_v24 }
 0x25d   :  { %1245 = vpow2.f32 %v706_v25  ;;  %v695_v26 = vpop.xlane.xlu1 %694 }
 0x25e   :  { %v703_v27 = vsub.f32 %v686_v12, %v695_v26 }
 0x260   :  { %v708_v28 = vmul.f32 1.442695, %v703_v27 }
 0x262   :  { %1247 = vpow2.f32 %v708_v28 }
 0x26a   :  { %v1246_v34 = vpop.eup %1245 }
 0x26b   :  { %v714_v35 = vsel %vm689_vm4, %v1246_v34, 0.0 }
 0x26c   :  { %715 = vadd.xlane.f32.xlu1 %v714_v35 }
 0x26f   :  { %v1248_v36 = vpop.eup %1247 }
 0x270   :  { %v717_v37 = vsel %vm689_vm4, %v1248_v36, 0.0 }
 0x271   :  { %718 = vadd.xlane.f32.xlu0 %v717_v37 }
 0x2cc   :  { %v698_v40 = vpop.xlane.xlu0 %697 }
 0x2cd   :  { %v704_v41 = vsub.f32 %v687_v16, %v698_v40 }
 0x2cf   :  { %v710_v42 = vmul.f32 1.442695, %v704_v41 }
 0x2d0   :  { %v701_v43 = vpop.xlane.xlu0 %700 }
 0x2d1   :  { %1249 = vpow2.f32 %v710_v42  ;;  %v705_v44 = vsub.f32 %v688_v20, %v701_v43 }
 0x2d3   :  { %v712_v45 = vmul.f32 1.442695, %v705_v44 }
 0x2d5   :  { %1251 = vpow2.f32 %v712_v45 }
 0x2de   :  { %v1250_v46 = vpop.eup %1249 }
 0x2df   :  { %v720_v47 = vsel %vm689_vm4, %v1250_v46, 0.0 }
 0x2e0   :  { %721 = vadd.xlane.f32.xlu1 %v720_v47 }
 0x2e2   :  { %v1252_v48 = vpop.eup %1251 }
 0x2e3   :  { %v723_v49 = vsel %vm689_vm4, %v1252_v48, 0.0 }
 0x2e4   :  { %724 = vadd.xlane.f32.xlu0 %v723_v49 }
 0x2f1   :  { %377 = vrot.lane.b32.xlu1 %v354_v39, %s1378_s0 }
 0x2f5   :  { %v716_v50 = vpop.xlane.xlu1 %715 }
 0x2f6   :  { %1253 = vrcp.f32 %v716_v50 }
 0x2fa   :  { %v719_v51 = vpop.xlane.xlu0 %718  ;;  %379 = vrot.lane.b32.xlu0 %v1192_v38, %s1378_s0 }
 0x2fb   :  { %1255 = vrcp.f32 %v719_v51 }
 0x303   :  { %v1254_v52 = vpop.eup %1253 }
 0x304   :  { %v727_v53 = vmul.f32 %v1254_v52, %v1246_v34 }
 0x306   :  { %1216 = vmatmul.mubr.msk.f32.vlgmr.msra.gmra.mxu1 %vm689_vm4, %v727_v53 }
 0x307   :  { %1219 = vmatpush3.msra.mxu1 %v1192_v38  ;;  %1220 = vmatprep.mubr.msk.f32.mxu1 %vm1377_vm1, %v1376_v0 }
 0x308   :  { %v1256_v54 = vpop.eup %1255  ;;  %1228 = vmatprep.subr.mxu1 %v1376_v0 }
 0x309   :  { %v729_v55 = vmul.f32 %v1256_v54, %v1248_v36 }
 0x30b   :  { %1221 = vmatmul.mubr.msk.f32.vlgmr.msra.gmra.mxu1 %vm689_vm4, %v729_v55 }
 0x30c   :  { %1230 = vmatprep.mubr.msk.f32.mxu1 %vm1377_vm1, %v1376_v0 }
 0x369   :  { %v722_v56 = vpop.xlane.xlu1 %721 }
 0x36a   :  { %1257 = vrcp.f32 %v722_v56 }
 0x36d   :  { %v725_v57 = vpop.xlane.xlu0 %724  ;;  %v378_v58 = vpop.permute.xlu1 %377 }
 0x36e   :  { %1259 = vrcp.f32 %v725_v57  ;;  %1224 = vmatpush3.msra.mxu0 %v378_v58 }
 0x371   :  { %v380_v59 = vpop.permute.xlu0 %379 }
 0x372   :  { %1229 = vmatpush3.msra.mxu1 %v380_v59 }
 0x377   :  { %v1258_v60 = vpop.eup %1257 }
 0x378   :  { %v731_v61 = vmul.f32 %v1258_v60, %v1250_v46 }
 0x37a   :  { %1226 = vmatmul.mubr.msk.f32.vlgmr.msra.gmra.mxu0 %vm689_vm4, %v731_v61 }
 0x37b   :  { %v1260_v62 = vpop.eup %1259 }
 0x37c   :  { %v733_v63 = vmul.f32 %v1260_v62, %v1252_v48 }
 0x37e   :  { %1231 = vmatmul.mubr.msk.f32.vlgmr.msra.gmra.mxu1 %vm689_vm4, %v733_v63 }
 0x37f   :  { %1332 = shalt.err (!%p1329_p5)
}
 0x380   :  { %1041 = dma.vmem_to_hbm [thread:$0]  %s1036_s12, 256, %s1523_s4, [#allocation4], %s1373_s28, %s1373_s28, %s1374_s29  }
 0x381   :  { %s1380_s16 = smov [#allocation9]  }
 0x382   :  { %s1047_s17 = sshll.u32 %s1380_s16, 4  ;;  %s1048_s17 = int_to_ptr.vmem [resolvable:$true] %s1047_s17 }
 0x383   :  { %s1341_s4 = scalar_lea.vmem %s1048_s17, 512  ;;  %p1346_p7 = scmp.lt.s32.totalorder %s1048_s17, %s1048_s17 }
 0x384   :  { %p1342_p6 = scmp.ne.s32.totalorder %s1048_s17, %s1341_s4  ;;  %p1347_p8 = scmp.lt.s32.totalorder %s1341_s4, %s1341_s4 }
 0x386   :  { %p1348_p9 = por %p1347_p8, %p1346_p7 }
 0x388   :  { %p1349_p10 = pnand %p1348_p9, %p1342_p6 }
 0x3c6   :  { %v803_v0 = vpop.f32.mrf.mxu1 }
 0x3c7   :  { %1026 = vst.msk [vmem:[#allocation9] sm:$0xff] %vm388_vm2, %v803_v0 }
 0x3c8   :  { %v1217_v1 = vpop.f32.mrf.mxu1 }
 0x3cb   :  { %v876_v2 = vpop.f32.mrf.mxu1 }
 0x3cc   :  { %1027 = vst.msk [vmem:[#allocation9 + $0x8] sm:$0xff] %vm388_vm2, %v876_v2 }
 0x3cd   :  { %v1222_v3 = vpop.f32.mrf.mxu1 }
 0x43a   :  { %v949_v4 = vpop.f32.mrf.mxu0 }
 0x43b   :  { %1028 = vst.msk [vmem:[#allocation9 + $0x10] sm:$0xff] %vm388_vm2, %v949_v4 }
 0x43c   :  { %v1227_v5 = vpop.f32.mrf.mxu0 }
 0x43e   :  { %v1022_v6 = vpop.f32.mrf.mxu1 }
 0x43f   :  { %1029 = vst.msk [vmem:[#allocation9 + $0x18] sm:$0xff] %vm388_vm2, %v1022_v6 }
 0x440   :  { %v1232_v7 = vpop.f32.mrf.mxu1 }
 0x441   :  { %1352 = shalt.err (!%p1349_p10)
}
 0x442   :  { %1053 = dma.vmem_to_hbm [thread:$0]  %s1048_s17, 512, %s1524_s5, [#allocation10], %s1373_s28, %s1373_s28, %s1374_s29  }
 0x443   :  { %1365 = dma.done.wait [#allocation4], 256  }
 0x444   :  { %1366 = vsyncadd [#allocation4], 4294967040 }
 0x445   :  { %1367 = dma.done.wait [#allocation10], 512  }
 0x446   :  { %1368 = vsyncadd [#allocation10], 4294966784 }
 0x447   :  { %1060 = vsyncpa [#allocation3], 1 }
 0x448   :  { %1061 = vsyncpa [#allocation6], 1 }
 0x449   :  { %1062 = vsyncpa [#allocation4], 1 }
 0x44a   :  { %1063 = vsyncpa [#allocation10], 1 }

</bundles_post_ra>
